<compile_context>
chip_gen: v5e
topology: v5e:2x2
jax: 0.10.0
libtpu: 0.0.40
codegen_flags: <defaults>
</compile_context>

<pallas_src>
import jax
import jax.numpy as jnp
from jax.experimental import pallas as pl
from jax.experimental.pallas import tpu as pltpu  # noqa: F401  (TPU backend)

DIM = 10
LANES = 128  # pad the last dim up to one full lane width (unmasked vst)


def _identity_kernel(w_ref, o_ref):
    # Forward pass: return the weight unchanged.  Because the output aliases
    # the input HBM buffer, this is just a VMEM tile write-back.
    o_ref[...] = w_ref[...]


@jax.jit
def model_forward(weight: jax.Array) -> jax.Array:
    """Equivalent of Model.forward(): returns the weight parameter."""
    # Lane-dense layout: (1, 128) tile, last dim on the 128-wide lane axis.
    w2d = jnp.pad(weight, (0, LANES - DIM)).reshape(1, LANES)
    out2d = pl.pallas_call(
        _identity_kernel,
        out_shape=jax.ShapeDtypeStruct((1, LANES), weight.dtype),
        # Single grid point, full-array blocks: no grid loop, no tiling.
        in_specs=[pl.BlockSpec((1, LANES), lambda: (0, 0))],
        out_specs=pl.BlockSpec((1, LANES), lambda: (0, 0)),
        # Reuse the input HBM buffer for the output: no fresh allocation and
        # no extra HBM round trip for this 40-byte payload.
        input_output_aliases={0: 0},
    )(w2d)
    return out2d[0, :DIM]


if __name__ == "__main__":
    # Deterministic parameter init (stand-in for torch.randn(DIM)).
    key = jax.random.PRNGKey(0)
    weight = jax.random.normal(key, (DIM,), dtype=jnp.float32)

    out = model_forward(weight)
    out = jax.block_until_ready(out)

    # Sanity check: forward() must return the weight exactly.
    assert out.shape == (DIM,)
    assert out.dtype == jnp.float32
    assert bool(jnp.all(out == weight))

    print("KERNEL_OK")
</pallas_src>

<mosaic_0001>
module attributes {stable_mosaic.version = 11 : i64} {
  func.func @_identity_kernel(%arg0: memref<1x128xf32, #tpu.memory_space<vmem>>, %arg1: memref<1x128xf32, #tpu.memory_space<vmem>>) attributes {dimension_semantics = [], scalar_prefetch = 0 : i64, scratch_operands = 0 : i64, tpu.core_type = #tpu.core_type<tc>} {
    %c0 = arith.constant 0 : index
    %c0_0 = arith.constant 0 : index
    %0 = vector.load %arg0[%c0, %c0_0] : memref<1x128xf32, #tpu.memory_space<vmem>>, vector<1x128xf32>
    %c0_1 = arith.constant 0 : index
    %c0_2 = arith.constant 0 : index
    %1 = vector.load %arg1[%c0_1, %c0_2] : memref<1x128xf32, #tpu.memory_space<vmem>>, vector<1x128xf32>
    tpu.vector_store %arg1[%c0_1, %c0_2], %0 {strides = array<i32>} : memref<1x128xf32, #tpu.memory_space<vmem>>, vector<1x128xf32>,
    return
  }
}

</mosaic_0001>

<bundles_post_ra>
// kernel: model_forward.1
= control target key start
LH: loop header
LB: loop body
LE: loop exit
PB: predicated region body
PF: predicated region fallthrough
CT: control target
= control target key end

     0   :  { %s30_s0 = inlined_call_operand.vmem [shape: f32[1,128], index: 0, kind: input, shape index: {}, may-alias: {0,1}]   ;;  %s31_s1 = inlined_call_operand.vmem [shape: f32[1,128], index: 1, kind: output, shape index: {}, may-alias: {0,1}]  }
   0x1   :  { %v8_v0 = vld [vmem:[%s30_s0] sm:$0x1] }
   0x2   :  { %9 = vst [vmem:[%s31_s1] sm:$0x1] %v8_v0 }

</bundles_post_ra>
